<compile_context>
chip_gen: v6e
topology: v6e:2x2x1
jax: 0.10.0
libtpu: 0.0.40
codegen_flags: <defaults>
</compile_context>

<pallas_src>
import jax
import jax.numpy as jnp
from jax.experimental import pallas as pl
from jax.experimental.pallas import tpu as pltpu


# ---------------------------------------------------------------------------
# Helpers
# ---------------------------------------------------------------------------

def _keep_from(m):
    """Boolean 'keep this pixel' mask from a loaded mask block (bool or int)."""
    return m if m.dtype == jnp.bool_ else (m != 0)


def _vmem_caps():
    """Generation-aware VMEM budgets (bytes)."""
    cap = None
    try:
        cap = int(pltpu.get_tpu_info().vmem_capacity_bytes)
    except Exception:
        cap = None
    if cap is None:
        cap = 64 * 2**20  # conservative fallback (v7x-sized)
    if cap >= 96 * 2**20:  # 128 MiB parts: v5e / v6e
        return {"resident_budget": 80 * 2**20, "limit_cap": 100 * 2**20}
    # 64 MiB/TC parts: v7x — leave headroom for compiler scratch + pipelining.
    return {"resident_budget": 30 * 2**20, "limit_cap": 44 * 2**20}


def _choose_row_tile(r, target, align):
    """Pick (row_tile, padded_rows): row_tile is `align`-aligned and divides
    padded_rows exactly; padded_rows >= r (pad rows carry mask=0)."""
    target = max(align, (target // align) * align)
    if r <= target:
        rt = ((r + align - 1) // align) * align
        return rt, rt
    for d in range(target, align - 1, -align):  # largest aligned exact divisor
        if r % d == 0:
            return d, r
    rt = target
    rp = ((r + rt - 1) // rt) * rt
    return rt, rp


# ---------------------------------------------------------------------------
# Kernels
# ---------------------------------------------------------------------------

def _resident_kernel(x_ref, m_ref, o_ref):
    """Single-block path: whole tensor resident in VMEM.

    x_ref: (B, C, *S) native dtype; m_ref: (B, 1, *S) bool/int8; o_ref like x.
    Works for both the (B, C, R, 128) view and the (B, C, HW) fallback.
    """
    keep = _keep_from(m_ref[...])                           # (B, 1, *S) bool
    mf = keep.astype(jnp.float32)
    inv_cnt = 1.0 / jnp.maximum(jnp.sum(mf), 1.0)           # clamp(min=1)

    num_ch = x_ref.shape[1]
    rest = (slice(None),) * (len(x_ref.shape) - 2)
    for c in range(num_ch):                                 # C small & static
        idx = (slice(None), slice(c, c + 1)) + rest
        xc = x_ref[idx]                                     # native dtype
        mean_c = jnp.sum(xc.astype(jnp.float32) * mf) * inv_cnt
        # select in native dtype (no f32 upcast of the pass-through branch)
        o_ref[idx] = jnp.where(keep, xc, mean_c.astype(o_ref.dtype))


def _reduce_kernel(x_ref, m_ref, acc_ref):
    """Tiled path, phase 1: per-channel masked lane-partial sums + valid count.

    x_ref:   (C, Rt, 128) block of x (native dtype).
    m_ref:   (Rt, 128) mask block (bool / int8), shared across channels.
    acc_ref: (A, 128) f32, A = round_up(C+1, 8); one slab per batch element
             (resident across the t axis).  Rows 0..C-1: channel sums,
             row C: valid count, rest: padding.
    """
    @pl.when(pl.program_id(1) == 0)                         # per-b init
    def _init():
        acc_ref[...] = jnp.zeros_like(acc_ref)

    mf = _keep_from(m_ref[...]).astype(jnp.float32)         # (Rt, 128)
    num_ch = x_ref.shape[0]
    rows = [jnp.sum(x_ref[c, :, :].astype(jnp.float32) * mf,
                    axis=0, keepdims=True) for c in range(num_ch)]
    rows.append(jnp.sum(mf, axis=0, keepdims=True))         # count row
    pad_rows = acc_ref.shape[0] - (num_ch + 1)
    if pad_rows > 0:
        rows.append(jnp.zeros((pad_rows, acc_ref.shape[1]), jnp.float32))
    # single lane-dense accumulate/store (no per-row RMW chain)
    acc_ref[...] = acc_ref[...] + jnp.concatenate(rows, axis=0)


def _apply_kernel(mean_ref, x_ref, m_ref, o_ref):
    """Tiled path, phase 2: fill masked pixels with the precomputed mean.

    mean_ref: (A, 128) f32, row c is mean_c broadcast across lanes (resident).
    x_ref / m_ref / o_ref: same blocking as the reduce phase.
    """
    keep = _keep_from(m_ref[...])                           # (Rt, 128) bool
    num_ch = x_ref.shape[0]
    for c in range(num_ch):
        mean_row = mean_ref[c:c + 1, :].astype(o_ref.dtype)  # (1, 128)
        # native-dtype select; (1,128) mean row sublane-broadcasts for free
        o_ref[c, :, :] = jnp.where(keep, x_ref[c, :, :], mean_row)


# ---------------------------------------------------------------------------
# Wrapper
# ---------------------------------------------------------------------------

def dummy_model_forward(x, mask, *, resident_budget_bytes=None,
                        target_tile_rows=None):
    """
    Args:
        x:    (B, C, H, W) float array (NCHW, like PyTorch).
        mask: (B, 1, H, W); True/1 = keep value, False/0 = fill with the
              channel-wise mean (pooled over the batch) of the valid pixels.
    Returns:
        (B, C, H, W) array, same dtype as x.
    """
    B, C, H, W = x.shape
    HW = H * W
    out_dtype = x.dtype
    itemsize = jnp.dtype(out_dtype).itemsize

    caps = _vmem_caps()
    if resident_budget_bytes is None:
        resident_budget_bytes = caps["resident_budget"]
    limit_cap = caps["limit_cap"]

    # Mask: keep 1-byte dtypes (bool/int8/uint8) as-is — no extra HBM pass;
    # only squeeze wider dtypes down to int8.
    m = mask if jnp.dtype(mask.dtype).itemsize == 1 else mask.astype(jnp.int8)
    m_itemsize = jnp.dtype(m.dtype).itemsize

    # Tight resident working-set estimate: x in + out (native), one channel of
    # f32 temporaries at a time, mask + its f32 cast.
    ch_elems = x.size // C
    resident_ws = (2 * x.size * itemsize
                   + 3 * ch_elems * 4
                   + m.size * (m_itemsize + 4))

    if resident_ws <= resident_budget_bytes:
        # ----------- resident single-block path (1 read + 1 write) ----------
        if HW % 128 == 0:
            x_v = x.reshape(B, C, HW // 128, 128)      # free reshape of NCHW
            m_v = m.reshape(B, 1, HW // 128, 128)
        else:
            x_v = x.reshape(B, C, HW)                  # full-array block
            m_v = m.reshape(B, 1, HW)
        vmem_limit = int(min(limit_cap, max(32 * 2**20, 2 * resident_ws)))
        out_v = pl.pallas_call(
            _resident_kernel,
            out_shape=jax.ShapeDtypeStruct(x_v.shape, out_dtype),
            in_specs=[
                pl.BlockSpec(x_v.shape, lambda: (0,) * x_v.ndim),
                pl.BlockSpec(m_v.shape, lambda: (0,) * m_v.ndim),
            ],
            out_specs=pl.BlockSpec(x_v.shape, lambda: (0,) * x_v.ndim),
            compiler_params=pltpu.CompilerParams(vmem_limit_bytes=vmem_limit),
        )(x_v, m_v)
        return out_v.reshape(B, C, H, W)

    # ---------------- tiled two-phase path (large inputs) -------------------
    R0 = pl.cdiv(HW, 128)                 # rows of 128 lanes needed
    align = 32                            # int8/bool mask tile & packed bf16

    if target_tile_rows is None:
        # Size the row tile from the VMEM budget (double-buffered in+out+mask),
        # capped at 2048 rows; per-step overhead is the limiter otherwise.
        bytes_per_row = 128 * (2 * C * itemsize + m_itemsize)
        budget = max(8 * 2**20, limit_cap - 8 * 2**20)
        target_tile_rows = max(align, min(2048, budget // (2 * bytes_per_row)))

    Rt, Rp = _choose_row_tile(int(R0), int(target_tile_rows), align)
    HW_pad = Rp * 128

    x_flat = x.reshape(B, C, HW)
    m_flat = m.reshape(B, 1, HW)
    if HW_pad != HW:
        # Ragged shapes: pad the flattened spatial axis; padded pixels carry
        # mask=0 so they never contribute to the sums, and their outputs are
        # sliced away below.
        x_flat = jnp.pad(x_flat, ((0, 0), (0, 0), (0, HW_pad - HW)))
        m_flat = jnp.pad(m_flat, ((0, 0), (0, 0), (0, HW_pad - HW)))
    x_v = x_flat.reshape(B, C, Rp, 128)
    m_v = m_flat.reshape(B, 1, Rp, 128)

    T = Rp // Rt
    acc_rows = ((C + 1 + 7) // 8) * 8                 # pad accumulator to 8 rows
    block_bytes = C * Rt * 128 * itemsize
    tiled_vmem = int(min(limit_cap, max(32 * 2**20, 8 * block_bytes + (4 << 20))))

    # Phase 1: per-batch lane-partial channel sums + valid count.
    # B axis "parallel" (dual-TC on v7x); t axis "arbitrary" (accumulation).
    acc = pl.pallas_call(
        _reduce_kernel,
        out_shape=jax.ShapeDtypeStruct((B, acc_rows, 128), jnp.float32),
        grid=(B, T),
        in_specs=[
            pl.BlockSpec((None, C, Rt, 128), lambda b, t: (b, 0, t, 0)),
            pl.BlockSpec((None, None, Rt, 128), lambda b, t: (b, 0, t, 0)),
        ],
        out_specs=pl.BlockSpec((None, acc_rows, 128), lambda b, t: (b, 0, 0)),
        compiler_params=pltpu.CompilerParams(
            dimension_semantics=("parallel", "arbitrary"),
            vmem_limit_bytes=tiled_vmem),
    )(x_v, m_v)

    # Channel means computed ONCE (tiny jnp op) — hoisted out of the apply pass.
    totals = acc.astype(jnp.float32).sum(axis=(0, 2))          # (acc_rows,)
    cnt = jnp.maximum(totals[C], 1.0)
    means = totals[:C] / cnt                                   # (C,)
    means_blk = jnp.zeros((acc_rows, 128), jnp.float32).at[:C, :].set(
        means[:, None])                                        # lane-broadcast

    # Phase 2: apply — embarrassingly parallel over (B, row tiles).
    out_v = pl.pallas_call(
        _apply_kernel,
        out_shape=jax.ShapeDtypeStruct((B, C, Rp, 128), out_dtype),
        grid=(B, T),
        in_specs=[
            pl.BlockSpec((acc_rows, 128), lambda b, t: (0, 0)),
            pl.BlockSpec((None, C, Rt, 128), lambda b, t: (b, 0, t, 0)),
            pl.BlockSpec((None, None, Rt, 128), lambda b, t: (b, 0, t, 0)),
        ],
        out_specs=pl.BlockSpec((None, C, Rt, 128), lambda b, t: (b, 0, t, 0)),
        compiler_params=pltpu.CompilerParams(
            dimension_semantics=("parallel", "parallel"),
            vmem_limit_bytes=tiled_vmem),
    )(means_blk, x_v, m_v)

    out = out_v.reshape(B, C, HW_pad)
    if HW_pad != HW:
        out = out[:, :, :HW]
    return out.reshape(B, C, H, W)


def init_params(key):
    """Deterministic init of the (unused-in-forward) 1x1 Conv2d(3, 3) params."""
    # TODO(synk): nn.Conv2d(3, 3, 1) is never applied in the PyTorch forward();
    # parameters exist only for state-dict parity.
    kw, kb = jax.random.split(key)
    weight = jax.random.normal(kw, (3, 3, 1, 1), dtype=jnp.float32) * 0.1
    bias = jax.random.normal(kb, (3,), dtype=jnp.float32) * 0.1
    return {"layer.weight": weight, "layer.bias": bias}


def _ref_forward(x, mask):
    """Pure-JAX reference (same math as the PyTorch forward)."""
    mb = jnp.broadcast_to(mask.astype(bool), x.shape)
    cnt = jnp.maximum(
        mb.sum(axis=(0, 2, 3), keepdims=True).astype(jnp.float32), 1.0)
    csum = jnp.where(mb, x.astype(jnp.float32), 0.0).sum(
        axis=(0, 2, 3), keepdims=True)
    mean = csum / cnt
    return jnp.where(mb, x, mean.astype(x.dtype))


if __name__ == "__main__":
    key = jax.random.PRNGKey(0)
    k_params, k_x, k_mask, k_x2, k_mask2 = jax.random.split(key, 5)

    _ = init_params(k_params)  # Conv2d params exist in the module but are unused

    B, C, H, W = 2, 3, 16, 16
    x = jax.random.normal(k_x, (B, C, H, W), dtype=jnp.float32)
    mask = jax.random.bernoulli(k_mask, p=0.7, shape=(B, 1, H, W))  # bool

    ref = _ref_forward(x, mask)

    # Path 1: resident single-block kernel (default for small shapes).
    out = jax.block_until_ready(dummy_model_forward(x, mask))
    assert out.shape == x.shape and out.dtype == x.dtype
    assert jnp.allclose(out, ref, atol=1e-5, rtol=1e-5)

    # Path 2: force the tiled two-phase path; HW=256 -> exercises row padding.
    out_tiled = jax.block_until_ready(
        dummy_model_forward(x, mask, resident_budget_bytes=0))
    assert out_tiled.shape == x.shape and out_tiled.dtype == x.dtype
    assert jnp.allclose(out_tiled, ref, atol=1e-5, rtol=1e-5)

    # Path 3: tiled path with multiple row tiles per batch (T > 1), exact tiling.
    H2 = W2 = 128
    x2 = jax.random.normal(k_x2, (B, C, H2, W2), dtype=jnp.float32)
    mask2 = jax.random.bernoulli(k_mask2, p=0.7, shape=(B, 1, H2, W2))
    ref2 = _ref_forward(x2, mask2)
    out2 = jax.block_until_ready(
        dummy_model_forward(x2, mask2, resident_budget_bytes=0,
                            target_tile_rows=32))
    assert out2.shape == x2.shape and out2.dtype == x2.dtype
    assert jnp.allclose(out2, ref2, atol=1e-5, rtol=1e-5)

    print("KERNEL_OK")
</pallas_src>

<mosaic_0001>
module attributes {stable_mosaic.version = 11 : i64} {
  func.func @_resident_kernel(%arg0: memref<2x3x2x128xf32, #tpu.memory_space<vmem>>, %arg1: memref<2x1x2x128xi32, #tpu.memory_space<vmem>>, %arg2: memref<2x3x2x128xf32, #tpu.memory_space<vmem>>) attributes {dimension_semantics = [], scalar_prefetch = 0 : i64, scratch_operands = 0 : i64, tpu.core_type = #tpu.core_type<tc>} {
    %c0 = arith.constant 0 : index
    %c0_0 = arith.constant 0 : index
    %c0_1 = arith.constant 0 : index
    %c0_2 = arith.constant 0 : index
    %0 = vector.load %arg1[%c0, %c0_0, %c0_1, %c0_2] : memref<2x1x2x128xi32, #tpu.memory_space<vmem>>, vector<2x1x2x128xi32>
    %cst = arith.constant dense<0> : vector<2x1x2x128xi32>
    %1 = arith.cmpi ne, %0, %cst : vector<2x1x2x128xi32>
    %2 = arith.extui %1 : vector<2x1x2x128xi1> to vector<2x1x2x128xi32>
    %3 = arith.sitofp %2 : vector<2x1x2x128xi32> to vector<2x1x2x128xf32>
    %4 = vector.shape_cast %3 : vector<2x1x2x128xf32> to vector<1x2x1x2x128xf32>
    %cst_3 = arith.constant dense<0.000000e+00> : vector<1xf32>
    %5 = vector.multi_reduction <add>, %4, %cst_3 [1, 2, 3, 4] : vector<1x2x1x2x128xf32> to vector<1xf32>
    %6 = vector.shape_cast %5 : vector<1xf32> to vector<1x1x1x1x1xf32>
    %7 = vector.extract %6[0, 0, 0, 0, 0] : f32 from vector<1x1x1x1x1xf32>
    %cst_4 = arith.constant 1.000000e+00 : f32
    %8 = arith.maximumf %7, %cst_4 : f32
    %cst_5 = arith.constant 1.000000e+00 : f32
    %9 = arith.divf %cst_5, %8 : f32
    %c0_6 = arith.constant 0 : index
    %c0_7 = arith.constant 0 : index
    %c0_8 = arith.constant 0 : index
    %c0_9 = arith.constant 0 : index
    %10 = vector.load %arg0[%c0_6, %c0_7, %c0_8, %c0_9] : memref<2x3x2x128xf32, #tpu.memory_space<vmem>>, vector<2x1x2x128xf32>
    %11 = arith.mulf %10, %3 : vector<2x1x2x128xf32>
    %12 = vector.shape_cast %11 : vector<2x1x2x128xf32> to vector<1x2x1x2x128xf32>
    %cst_10 = arith.constant dense<0.000000e+00> : vector<1xf32>
    %13 = vector.multi_reduction <add>, %12, %cst_10 [1, 2, 3, 4] : vector<1x2x1x2x128xf32> to vector<1xf32>
    %14 = vector.shape_cast %13 : vector<1xf32> to vector<1x1x1x1x1xf32>
    %15 = vector.extract %14[0, 0, 0, 0, 0] : f32 from vector<1x1x1x1x1xf32>
    %16 = arith.mulf %15, %9 : f32
    %17 = vector.broadcast %16 : f32 to vector<2x1x2x128xf32>
    %18 = arith.select %1, %10, %17 : vector<2x1x2x128xi1>, vector<2x1x2x128xf32>
    %c0_11 = arith.constant 0 : index
    %c0_12 = arith.constant 0 : index
    %c0_13 = arith.constant 0 : index
    %c0_14 = arith.constant 0 : index
    %19 = vector.load %arg2[%c0_11, %c0_12, %c0_13, %c0_14] : memref<2x3x2x128xf32, #tpu.memory_space<vmem>>, vector<2x1x2x128xf32>
    tpu.vector_store %arg2[%c0_11, %c0_12, %c0_13, %c0_14], %18 {strides = array<i32>} : memref<2x3x2x128xf32, #tpu.memory_space<vmem>>, vector<2x1x2x128xf32>,
    %c0_15 = arith.constant 0 : index
    %c1 = arith.constant 1 : index
    %c0_16 = arith.constant 0 : index
    %c0_17 = arith.constant 0 : index
    %20 = vector.load %arg0[%c0_15, %c1, %c0_16, %c0_17] : memref<2x3x2x128xf32, #tpu.memory_space<vmem>>, vector<2x1x2x128xf32>
    %21 = arith.mulf %20, %3 : vector<2x1x2x128xf32>
    %22 = vector.shape_cast %21 : vector<2x1x2x128xf32> to vector<1x2x1x2x128xf32>
    %cst_18 = arith.constant dense<0.000000e+00> : vector<1xf32>
    %23 = vector.multi_reduction <add>, %22, %cst_18 [1, 2, 3, 4] : vector<1x2x1x2x128xf32> to vector<1xf32>
    %24 = vector.shape_cast %23 : vector<1xf32> to vector<1x1x1x1x1xf32>
    %25 = vector.extract %24[0, 0, 0, 0, 0] : f32 from vector<1x1x1x1x1xf32>
    %26 = arith.mulf %25, %9 : f32
    %27 = vector.broadcast %26 : f32 to vector<2x1x2x128xf32>
    %28 = arith.select %1, %20, %27 : vector<2x1x2x128xi1>, vector<2x1x2x128xf32>
    %c0_19 = arith.constant 0 : index
    %c1_20 = arith.constant 1 : index
    %c0_21 = arith.constant 0 : index
    %c0_22 = arith.constant 0 : index
    %29 = vector.load %arg2[%c0_19, %c1_20, %c0_21, %c0_22] : memref<2x3x2x128xf32, #tpu.memory_space<vmem>>, vector<2x1x2x128xf32>
    tpu.vector_store %arg2[%c0_19, %c1_20, %c0_21, %c0_22], %28 {strides = array<i32>} : memref<2x3x2x128xf32, #tpu.memory_space<vmem>>, vector<2x1x2x128xf32>,
    %c0_23 = arith.constant 0 : index
    %c2 = arith.constant 2 : index
    %c0_24 = arith.constant 0 : index
    %c0_25 = arith.constant 0 : index
    %30 = vector.load %arg0[%c0_23, %c2, %c0_24, %c0_25] : memref<2x3x2x128xf32, #tpu.memory_space<vmem>>, vector<2x1x2x128xf32>
    %31 = arith.mulf %30, %3 : vector<2x1x2x128xf32>
    %32 = vector.shape_cast %31 : vector<2x1x2x128xf32> to vector<1x2x1x2x128xf32>
    %cst_26 = arith.constant dense<0.000000e+00> : vector<1xf32>
    %33 = vector.multi_reduction <add>, %32, %cst_26 [1, 2, 3, 4] : vector<1x2x1x2x128xf32> to vector<1xf32>
    %34 = vector.shape_cast %33 : vector<1xf32> to vector<1x1x1x1x1xf32>
    %35 = vector.extract %34[0, 0, 0, 0, 0] : f32 from vector<1x1x1x1x1xf32>
    %36 = arith.mulf %35, %9 : f32
    %37 = vector.broadcast %36 : f32 to vector<2x1x2x128xf32>
    %38 = arith.select %1, %30, %37 : vector<2x1x2x128xi1>, vector<2x1x2x128xf32>
    %c0_27 = arith.constant 0 : index
    %c2_28 = arith.constant 2 : index
    %c0_29 = arith.constant 0 : index
    %c0_30 = arith.constant 0 : index
    %39 = vector.load %arg2[%c0_27, %c2_28, %c0_29, %c0_30] : memref<2x3x2x128xf32, #tpu.memory_space<vmem>>, vector<2x1x2x128xf32>
    tpu.vector_store %arg2[%c0_27, %c2_28, %c0_29, %c0_30], %38 {strides = array<i32>} : memref<2x3x2x128xf32, #tpu.memory_space<vmem>>, vector<2x1x2x128xf32>,
    return
  }
}

</mosaic_0001>

<bundles_post_ra>
// kernel: tpu_custom_call.1
= control target key start
LH: loop header
LB: loop body
LE: loop exit
PB: predicated region body
PF: predicated region fallthrough
CT: control target
= control target key end

     0   :  { %7 = vsyncpa [#allocation3], 0  ;;  %s295_s0 = inlined_call_operand.hbm [shape: f32[2,3,2,128], index: 0, kind: input, shape index: {}]   ;;  %s296_s1 = inlined_call_operand.vmem [shape: s32[2,1,2,128], index: 1, kind: input, shape index: {}]   ;;  %s297_s2 = inlined_call_operand.hbm [shape: f32[2,3,2,128], index: 2, kind: output, shape index: {}]  }
   0x1   :  { %8 = vsyncpa [#allocation4], 0  ;;  %s202_s9 = smov [#allocation2]  }
   0x2   :  { %s14_s10 = sshll.u32 %s202_s9, 4  ;;  %s15_s10 = int_to_ptr.vmem [resolvable:$true] %s14_s10 }
   0x3   :  { %s166_s11 = scalar_lea.vmem %s15_s10, 192  ;;  %p171_p1 = scmp.lt.s32.totalorder %s15_s10, %s15_s10 }
   0x4   :  { %p167_p0 = scmp.ne.s32.totalorder %s15_s10, %s166_s11  ;;  %p172_p2 = scmp.lt.s32.totalorder %s166_s11, %s166_s11 }
   0x6   :  { %p173_p3 = por %p172_p2, %p171_p1 }
   0x8   :  { %p174_p4 = pnand %p173_p3, %p167_p0 }
   0xa   :  { %177 = shalt.err (!%p174_p4)
}
   0xb   :  { %s203_s12 = smov 32   ;;  %s204_s13 = smov 2  }
   0xc   :  { %20 = dma.hbm_to_vmem [thread:$0]  %s295_s0, 192, %s15_s10, [#allocation3], %s203_s12, %s203_s12, %s204_s13  }
   0xd   :  { %198 = dma.done.wait [#allocation3], 192  }
   0xe   :  { %199 = vsyncadd [#allocation3], 4294967104  ;;  %vm34_vm0 = vcmask 1041408   ;;  %v232_v0 = vld [vmem:[%s296_s1] sm:$0x3]  ;;  %v205_v5 = vmov 0.0  }
   0xf   :  { %v237_v1 = vld [vmem:[%s296_s1 + $0x2] sm:$0x3]  ;;  %vm28_vm1 = vcmp.ne.s32.totalorder %v232_v0, 0  ;;  %v243_v3 = vld [vmem:[#allocation2 + $0x8] sm:$0x3]  ;;  %s206_s1 = smov 1.0  }
  0x10   :  { %v239_v2 = vld [vmem:[#allocation2 + $0x2] sm:$0x3]  ;;  %vm29_vm2 = vcmp.ne.s32.totalorder %v237_v1, 0  ;;  %v245_v4 = vld [vmem:[#allocation2 + $0x4] sm:$0x3]  ;;  %v138_v6 = vsel %vm28_vm1, 1.0, %v205_v5 }
  0x11   :  { %v139_v7 = vsel %vm29_vm2, 1.0, %v205_v5  ;;  %v251_v8 = vld [vmem:[#allocation2 + $0xa] sm:$0x3]  ;;  %v253_v9 = vld [vmem:[#allocation2] sm:$0x3]  ;;  %v35_v10 = vsel %vm34_vm0, %v138_v6, 0.0  ;;  %v76_v12 = vmul.f32 %v138_v6, %v239_v2  ;;  %v100_v16 = vmul.f32 %v138_v6, %v245_v4 }
  0x12   :  { %v36_v11 = vsel %vm34_vm0, %v139_v7, 0.0  ;;  %v77_v13 = vmul.f32 %v139_v7, %v243_v3  ;;  %v259_v14 = vld [vmem:[#allocation2 + $0x6] sm:$0x3]  ;;  %v101_v17 = vmul.f32 %v139_v7, %v251_v8  ;;  %v53_v18 = vmul.f32 %v138_v6, %v253_v9  ;;  %s207_s23 = smov [#allocation5]  }
  0x13   :  { %v37_v15 = vadd.f32 %v36_v11, %v35_v10  ;;  %v78_v19 = vsel %vm34_vm0, %v76_v12, 0.0  ;;  %v54_v21 = vmul.f32 %v139_v7, %v259_v14  ;;  %v102_v23 = vsel %vm34_vm0, %v100_v16, 0.0  ;;  %s126_s24 = sshll.u32 %s207_s23, 4  ;;  %s127_s24 = int_to_ptr.vmem [resolvable:$true] %s126_s24 }
  0x14   :  { %v79_v20 = vsel %vm34_vm0, %v77_v13, 0.0  ;;  %v103_v24 = vsel %vm34_vm0, %v101_v17, 0.0  ;;  %v55_v25 = vsel %vm34_vm0, %v53_v18, 0.0  ;;  %s178_s30 = scalar_lea.vmem %s127_s24, 192  ;;  %p183_p6 = scmp.lt.s32.totalorder %s127_s24, %s127_s24 }
  0x15   :  { %38 = vadd.xlane.f32.xlu0 %v37_v15  ;;  %v80_v22 = vadd.f32 %v79_v20, %v78_v19  ;;  %v56_v26 = vsel %vm34_vm0, %v54_v21, 0.0  ;;  %v104_v27 = vadd.f32 %v103_v24, %v102_v23  ;;  %p179_p5 = scmp.ne.s32.totalorder %s127_s24, %s178_s30  ;;  %p184_p7 = scmp.lt.s32.totalorder %s178_s30, %s178_s30 }
  0x16   :  { %v57_v28 = vadd.f32 %v56_v26, %v55_v25 }
  0x17   :  { %81 = vadd.xlane.f32.xlu1 %v80_v22  ;;  %p185_p8 = por %p184_p7, %p183_p6 }
  0x19   :  { %58 = vadd.xlane.f32.xlu0 %v57_v28  ;;  %p186_p9 = pnand %p185_p8, %p179_p5 }
  0x1b   :  { %105 = vadd.xlane.f32.xlu1 %v104_v27 }
  0x9e   :  { %v39_v29 = vpop.xlane.xlu0 %38 }
  0x9f   :  { %v40_v30 = vrot.slane %v39_v29, 4 }
  0xa0   :  { %v82_v36 = vpop.xlane.xlu1 %81 }
  0xa1   :  { %v41_v31 = vadd.f32 %v40_v30, %v39_v29  ;;  %v83_v40 = vrot.slane %v82_v36, 4 }
  0xa2   :  { %v59_v37 = vpop.xlane.xlu0 %58 }
  0xa3   :  { %v42_v32 = vrot.slane %v41_v31, 2  ;;  %v60_v39 = vrot.slane %v59_v37, 4  ;;  %v84_v43 = vadd.f32 %v83_v40, %v82_v36 }
  0xa4   :  { %v106_v38 = vpop.xlane.xlu1 %105 }
  0xa5   :  { %v43_v33 = vadd.f32 %v42_v32, %v41_v31  ;;  %v107_v41 = vrot.slane %v106_v38, 4  ;;  %v61_v42 = vadd.f32 %v60_v39, %v59_v37  ;;  %v85_v47 = vrot.slane %v84_v43, 2 }
  0xa7   :  { %v44_v34 = vrot.slane %v43_v33, 1  ;;  %v108_v44 = vadd.f32 %v107_v41, %v106_v38  ;;  %v62_v46 = vrot.slane %v61_v42, 2  ;;  %v86_v50 = vadd.f32 %v85_v47, %v84_v43 }
  0xa9   :  { %v45_v35 = vadd.f32 %v44_v34, %v43_v33  ;;  %v109_v48 = vrot.slane %v108_v44, 2  ;;  %v63_v49 = vadd.f32 %v62_v46, %v61_v42  ;;  %v87_v53 = vrot.slane %v86_v50, 1 }
  0xab   :  { %140 = vpush %v45_v35  ;;  %v110_v51 = vadd.f32 %v109_v48, %v108_v44  ;;  %v64_v52 = vrot.slane %v63_v49, 1  ;;  %v88_v57 = vadd.f32 %v87_v53, %v86_v50 }
  0xad   :  { %v111_v54 = vrot.slane %v110_v51, 1  ;;  %v65_v56 = vadd.f32 %v64_v52, %v63_v49 }
  0xaf   :  { %v112_v58 = vadd.f32 %v111_v54, %v110_v51 }
  0xdc   :  { %s141_s0 = spop %140 }
  0xdd   :  { %s47_s20 = smax.f32 %s206_s1, %s141_s0 }
  0xde   :  { %v48_v45 = vstv %s47_s20 }
  0xdf   :  { %156 = vrcp.f32 %v48_v45 }
  0xec   :  { %v157_v55 = vpop.eup %156 }
  0xed   :  { %142 = vpush %v157_v55 }
  0xee   :  { %144 = vpush %v65_v56 }
  0xef   :  { %146 = vpush %v88_v57 }
  0xf0   :  { %148 = vpush %v112_v58 }
 0x11e   :  { %s143_s21 = spop %142 }
 0x11f   :  { %s145_s22 = spop %144 }
 0x120   :  { %s67_s25 = smul.f32 %s145_s22, %s143_s21  ;;  %s147_s26 = spop %146 }
 0x121   :  { %s90_s27 = smul.f32 %s147_s26, %s143_s21  ;;  %s149_s28 = spop %148 }
 0x122   :  { %v68_v59 = vstv %s67_s25  ;;  %s114_s29 = smul.f32 %s149_s28, %s143_s21 }
 0x123   :  { %v69_v60 = vsel %vm28_vm1, %v253_v9, %v68_v59  ;;  %v70_v61 = vsel %vm29_vm2, %v259_v14, %v68_v59  ;;  %v91_v62 = vstv %s90_s27 }
 0x124   :  { %71 = vst [vmem:[#allocation5] sm:$0x3] %v69_v60  ;;  %72 = vst [vmem:[#allocation5 + $0x6] sm:$0x3] %v70_v61  ;;  %v92_v63 = vsel %vm28_vm1, %v239_v2, %v91_v62  ;;  %v93_v5 = vsel %vm29_vm2, %v243_v3, %v91_v62  ;;  %v115_v6 = vstv %s114_s29 }
 0x125   :  { %95 = vst [vmem:[#allocation5 + $0x2] sm:$0x3] %v92_v63  ;;  %96 = vst [vmem:[#allocation5 + $0x8] sm:$0x3] %v93_v5  ;;  %v116_v7 = vsel %vm28_vm1, %v245_v4, %v115_v6  ;;  %v117_v9 = vsel %vm29_vm2, %v251_v8, %v115_v6 }
 0x126   :  { %119 = vst [vmem:[#allocation5 + $0x4] sm:$0x3] %v116_v7  ;;  %120 = vst [vmem:[#allocation5 + $0xa] sm:$0x3] %v117_v9 }
 0x127   :  { %189 = shalt.err (!%p186_p9)
}
 0x128   :  { %132 = dma.vmem_to_hbm [thread:$0]  %s127_s24, 192, %s297_s2, [#allocation4], %s203_s12, %s203_s12, %s204_s13  }
 0x129   :  { %200 = dma.done.wait [#allocation4], 192  }
 0x12a   :  { %201 = vsyncadd [#allocation4], 4294967104 }
 0x12b   :  { %136 = vsyncpa [#allocation3], 1 }
 0x12c   :  { %137 = vsyncpa [#allocation4], 1 }

</bundles_post_ra>
